<compile_context>
chip_gen: v6e
topology: v6e:2x2x1
jax: 0.10.0
libtpu: 0.0.40
codegen_flags: <defaults>
</compile_context>

<pallas_src>
import math
import jax
import jax.numpy as jnp
from jax import lax
from jax.experimental import pallas as pl
from jax.experimental.pallas import tpu as pltpu  # noqa: F401  (kept for TPU-specific hooks)


def make_mha_kernel(batch, seq_len, input_dim, embed_dim, num_heads,
                    matmul_dtype=jnp.float32):
    """matmul_dtype is a hook for bf16 operands on v6e/v7x at larger shapes.
    At S=8/E=32 the MXU is ~idle, so keep f32 (exact parity, no cast work);
    on v5e always keep f32 (no bf16 VPU/EUP)."""
    B, S, Din, E, H = batch, seq_len, input_dim, embed_dim, num_heads
    hd = E // H

    def kernel(x_ref, wqkv_ref, bqkv_ref, wo_ref, bo_ref, o_ref):
        # Whole problem (~20 KB) lives in VMEM; single invocation, no pipeline.
        wqkv = wqkv_ref[...].astype(matmul_dtype)   # (3E, Din) head-major, Q rows pre-scaled
        bqkv = bqkv_ref[...]                        # (3E, 1)
        wo = wo_ref[...].astype(matmul_dtype)       # (E, E) PyTorch (out, in) layout, used as-is
        bo = bo_ref[...]                            # (E, 1)

        for b in range(B):                          # B = 2: static unroll, one kernel step
            x_b = x_ref[b].astype(matmul_dtype)     # (Din, S) feature-major

            # Fused QKV projection in feature-major orientation -> (3E, S).
            qkv_t = jnp.dot(wqkv, x_b, preferred_element_type=jnp.float32) + bqkv

            head_vals = []
            for h in range(H):
                # Sublane-aligned 8-row slices (hd == f32 sublane tile): no lane rotates.
                q = qkv_t[h * hd:(h + 1) * hd, :].astype(matmul_dtype)              # (hd, S)
                k = qkv_t[E + h * hd:E + (h + 1) * hd, :].astype(matmul_dtype)      # (hd, S)
                v = qkv_t[2 * E + h * hd:2 * E + (h + 1) * hd, :].astype(matmul_dtype)  # (hd, S)

                # logits[i, j] = sum_d q[d, i] * k[d, j]  (scale already folded into Q)
                logits = lax.dot_general(
                    q, k, dimension_numbers=(((0,), (0,)), ((), ())),
                    preferred_element_type=jnp.float32)          # (S, S)

                # Exact softmax: only H*S denominators, approx reciprocal buys nothing.
                m = jnp.max(logits, axis=-1, keepdims=True)
                e = jnp.exp(logits - m)
                attn = e / jnp.sum(e, axis=-1, keepdims=True)    # (S, S)

                # values^T[d, i] = sum_j v[d, j] * attn[i, j]  (contract the key axis)
                vals_h = lax.dot_general(
                    v, attn.astype(matmul_dtype),
                    dimension_numbers=(((1,), (1,)), ((), ())),
                    preferred_element_type=jnp.float32)          # (hd, S)
                head_vals.append(vals_h)

            # Recombine heads along sublanes (cheap): no VMEM scratch round trip.
            vals_t = jnp.concatenate(head_vals, axis=0)          # (E, S)

            # Output projection: o^T = wo @ values^T + bo.
            o_t = jnp.dot(wo, vals_t.astype(matmul_dtype),
                          preferred_element_type=jnp.float32) + bo   # (E, S)
            o_ref[b] = o_t.astype(o_ref.dtype)

    return kernel


def multihead_attention(x_sbd, wqkv, bqkv, wo, bo, num_heads,
                        matmul_dtype=jnp.float32):
    """x_sbd: (seq, batch, input_dim), exactly like the PyTorch module's input.
    wqkv/bqkv/wo/bo are in the PyTorch nn.Linear layout ((out, in) weights).
    Returns (batch, seq, embed_dim), matching the module's return layout."""
    S, B, Din = x_sbd.shape
    E = wo.shape[0]
    hd = E // num_heads
    scale = 1.0 / math.sqrt(2.0 * hd)   # scaling_factor = 2 in the module (exactly 0.25 here)

    # Glue: feature-major input layout for the kernel, (B, Din, S).
    x_t = jnp.transpose(x_sbd, (1, 2, 0))

    # ---- one-time wrapper-side weight preprocessing ----
    # PyTorch qkv row r: head = r // (3*hd); within-head [0,hd)=q, [hd,2hd)=k, [2hd,3hd)=v.
    w4 = wqkv.reshape(num_heads, 3, hd, Din)
    wq = w4[:, 0].reshape(E, Din) * scale       # fold 1/sqrt(2*hd) into the Q rows
    wk = w4[:, 1].reshape(E, Din)
    wv = w4[:, 2].reshape(E, Din)
    wqkv_hm = jnp.concatenate([wq, wk, wv], axis=0)              # (3E, Din), head-major

    b4 = bqkv.reshape(num_heads, 3, hd)
    bq = b4[:, 0].reshape(E) * scale
    bk = b4[:, 1].reshape(E)
    bv = b4[:, 2].reshape(E)
    bqkv_col = jnp.concatenate([bq, bk, bv]).reshape(3 * E, 1)   # column bias (broadcast over S)

    bo_col = bo.reshape(E, 1)                                    # column bias

    kernel = make_mha_kernel(B, S, Din, E, num_heads, matmul_dtype=matmul_dtype)

    # TODO(synk): optional absolute/relative positional-bias adds and the
    # return_attention=True path (module defaults None/False) are not implemented.
    #
    # Single invocation, no grid: all operands are placed whole in VMEM, so there
    # is no per-step pipeline overhead and weights are DMA'd exactly once.
    o_t = pl.pallas_call(
        kernel,
        out_shape=jax.ShapeDtypeStruct((B, E, S), jnp.float32),
    )(x_t, wqkv_hm, bqkv_col, wo, bo_col)

    return jnp.transpose(o_t, (0, 2, 1))   # (B, S, E)


def xavier_uniform(key, shape):
    # PyTorch nn.init.xavier_uniform_ for a Linear weight (out, in)
    fan_out, fan_in = shape
    bound = math.sqrt(6.0 / (fan_in + fan_out))
    return jax.random.uniform(key, shape, dtype=jnp.float32,
                              minval=-bound, maxval=bound)


def reference_mha(x_sbd, wqkv, bqkv, wo, bo, num_heads):
    """Pure-JAX reference mirroring the PyTorch forward exactly."""
    x = jnp.transpose(x_sbd, (1, 0, 2))                   # (B, S, Din)
    B, S, _ = x.shape
    E = wo.shape[0]
    hd = E // num_heads
    qkv = x @ wqkv.T + bqkv                               # (B, S, 3E)
    qkv = qkv.reshape(B, S, num_heads, 3 * hd).transpose(0, 2, 1, 3)
    q, k, v = qkv[..., :hd], qkv[..., hd:2 * hd], qkv[..., 2 * hd:]
    logits = jnp.einsum('bhqd,bhkd->bhqk', q, k) / math.sqrt(2 * hd)
    attn = jax.nn.softmax(logits, axis=-1)
    vals = jnp.einsum('bhqk,bhkd->bhqd', attn, v)
    vals = vals.transpose(0, 2, 1, 3).reshape(B, S, E)
    return vals @ wo.T + bo


if __name__ == "__main__":
    seq, batch, input_dim = 8, 2, 32
    embed_dim, num_heads = 32, 4

    key = jax.random.PRNGKey(0)
    kx, kq, ko = jax.random.split(key, 3)

    # module input: (seq, batch, input_dim) — as the PyTorch forward expects
    x = jax.random.normal(kx, (seq, batch, input_dim), dtype=jnp.float32)

    # deterministic parameter init (xavier uniform weights, zero bias)
    wqkv = xavier_uniform(kq, (3 * embed_dim, input_dim))
    bqkv = jnp.zeros((3 * embed_dim,), jnp.float32)
    wo = xavier_uniform(ko, (embed_dim, embed_dim))
    bo = jnp.zeros((embed_dim,), jnp.float32)

    out = multihead_attention(x, wqkv, bqkv, wo, bo, num_heads)
    out = jax.block_until_ready(out)

    ref = reference_mha(x, wqkv, bqkv, wo, bo, num_heads)
    assert out.shape == (batch, seq, embed_dim)
    # exact softmax + f32 matmuls: only accumulation-order rounding differences remain
    assert jnp.allclose(out, ref, atol=1e-4, rtol=1e-4), "mismatch vs reference"

    print("KERNEL_OK")
</pallas_src>

<mosaic_0001>
module attributes {stable_mosaic.version = 11 : i64} {
  func.func @kernel(%arg0: memref<2x32x8xf32, #tpu.memory_space<vmem>>, %arg1: memref<96x32xf32, #tpu.memory_space<vmem>>, %arg2: memref<96x1xf32, #tpu.memory_space<vmem>>, %arg3: memref<32x32xf32, #tpu.memory_space<vmem>>, %arg4: memref<32x1xf32, #tpu.memory_space<vmem>>, %arg5: memref<2x32x8xf32, #tpu.memory_space<vmem>>) attributes {dimension_semantics = [], scalar_prefetch = 0 : i64, scratch_operands = 0 : i64, tpu.core_type = #tpu.core_type<tc>} {
    %c0 = arith.constant 0 : index
    %c0_0 = arith.constant 0 : index
    %0 = vector.load %arg1[%c0, %c0_0] : memref<96x32xf32, #tpu.memory_space<vmem>>, vector<96x32xf32>
    %c0_1 = arith.constant 0 : index
    %c0_2 = arith.constant 0 : index
    %1 = vector.load %arg2[%c0_1, %c0_2] : memref<96x1xf32, #tpu.memory_space<vmem>>, vector<96x1xf32>
    %c0_3 = arith.constant 0 : index
    %c0_4 = arith.constant 0 : index
    %2 = vector.load %arg3[%c0_3, %c0_4] : memref<32x32xf32, #tpu.memory_space<vmem>>, vector<32x32xf32>
    %c0_5 = arith.constant 0 : index
    %c0_6 = arith.constant 0 : index
    %3 = vector.load %arg4[%c0_5, %c0_6] : memref<32x1xf32, #tpu.memory_space<vmem>>, vector<32x1xf32>
    %c0_7 = arith.constant 0 : index
    %c0_8 = arith.constant 0 : index
    %c0_9 = arith.constant 0 : index
    %4 = vector.load %arg0[%c0_7, %c0_8, %c0_9] : memref<2x32x8xf32, #tpu.memory_space<vmem>>, vector<1x32x8xf32>
    %5 = vector.shape_cast %4 : vector<1x32x8xf32> to vector<32x8xf32>
    %cst = arith.constant dense<0.000000e+00> : vector<96x8xf32>
    %6 = tpu.matmul %0, %5, %cst {dimension_numbers = #tpu.dot_dimension_numbers<[1], [0], [0], [1], [0, 0, 1, 1], [], []>} : vector<96x32xf32>, vector<32x8xf32>, vector<96x8xf32> -> vector<96x8xf32>
    %7 = vector.broadcast %1 : vector<96x1xf32> to vector<96x8xf32>
    %8 = arith.addf %6, %7 : vector<96x8xf32>
    %9 = vector.extract_strided_slice %8 {offsets = [0, 0], sizes = [8, 8], strides = [1, 1]} : vector<96x8xf32> to vector<8x8xf32>
    %10 = vector.extract_strided_slice %8 {offsets = [32, 0], sizes = [8, 8], strides = [1, 1]} : vector<96x8xf32> to vector<8x8xf32>
    %11 = vector.extract_strided_slice %8 {offsets = [64, 0], sizes = [8, 8], strides = [1, 1]} : vector<96x8xf32> to vector<8x8xf32>
    %cst_10 = arith.constant dense<0.000000e+00> : vector<8x8xf32>
    %12 = tpu.matmul %9, %10, %cst_10 {dimension_numbers = #tpu.dot_dimension_numbers<[0], [0], [1], [1], [0, 1, 1, 1], [], []>} : vector<8x8xf32>, vector<8x8xf32>, vector<8x8xf32> -> vector<8x8xf32>
    %cst_11 = arith.constant dense<0xFF800000> : vector<8xf32>
    %13 = vector.multi_reduction <maximumf>, %12, %cst_11 [1] : vector<8x8xf32> to vector<8xf32>
    %14 = vector.shape_cast %13 : vector<8xf32> to vector<8x1xf32>
    %15 = vector.broadcast %14 : vector<8x1xf32> to vector<8x8xf32>
    %16 = arith.subf %12, %15 : vector<8x8xf32>
    %17 = math.exp %16 : vector<8x8xf32>
    %cst_12 = arith.constant dense<0.000000e+00> : vector<8xf32>
    %18 = vector.multi_reduction <add>, %17, %cst_12 [1] : vector<8x8xf32> to vector<8xf32>
    %19 = vector.shape_cast %18 : vector<8xf32> to vector<8x1xf32>
    %20 = vector.broadcast %19 : vector<8x1xf32> to vector<8x8xf32>
    %21 = arith.divf %17, %20 : vector<8x8xf32>
    %cst_13 = arith.constant dense<0.000000e+00> : vector<8x8xf32>
    %22 = tpu.matmul %11, %21, %cst_13 {dimension_numbers = #tpu.dot_dimension_numbers<[1], [1], [0], [0], [0, 0, 1, 0], [], []>} : vector<8x8xf32>, vector<8x8xf32>, vector<8x8xf32> -> vector<8x8xf32>
    %23 = vector.extract_strided_slice %8 {offsets = [8, 0], sizes = [8, 8], strides = [1, 1]} : vector<96x8xf32> to vector<8x8xf32>
    %24 = vector.extract_strided_slice %8 {offsets = [40, 0], sizes = [8, 8], strides = [1, 1]} : vector<96x8xf32> to vector<8x8xf32>
    %25 = vector.extract_strided_slice %8 {offsets = [72, 0], sizes = [8, 8], strides = [1, 1]} : vector<96x8xf32> to vector<8x8xf32>
    %cst_14 = arith.constant dense<0.000000e+00> : vector<8x8xf32>
    %26 = tpu.matmul %23, %24, %cst_14 {dimension_numbers = #tpu.dot_dimension_numbers<[0], [0], [1], [1], [0, 1, 1, 1], [], []>} : vector<8x8xf32>, vector<8x8xf32>, vector<8x8xf32> -> vector<8x8xf32>
    %cst_15 = arith.constant dense<0xFF800000> : vector<8xf32>
    %27 = vector.multi_reduction <maximumf>, %26, %cst_15 [1] : vector<8x8xf32> to vector<8xf32>
    %28 = vector.shape_cast %27 : vector<8xf32> to vector<8x1xf32>
    %29 = vector.broadcast %28 : vector<8x1xf32> to vector<8x8xf32>
    %30 = arith.subf %26, %29 : vector<8x8xf32>
    %31 = math.exp %30 : vector<8x8xf32>
    %cst_16 = arith.constant dense<0.000000e+00> : vector<8xf32>
    %32 = vector.multi_reduction <add>, %31, %cst_16 [1] : vector<8x8xf32> to vector<8xf32>
    %33 = vector.shape_cast %32 : vector<8xf32> to vector<8x1xf32>
    %34 = vector.broadcast %33 : vector<8x1xf32> to vector<8x8xf32>
    %35 = arith.divf %31, %34 : vector<8x8xf32>
    %cst_17 = arith.constant dense<0.000000e+00> : vector<8x8xf32>
    %36 = tpu.matmul %25, %35, %cst_17 {dimension_numbers = #tpu.dot_dimension_numbers<[1], [1], [0], [0], [0, 0, 1, 0], [], []>} : vector<8x8xf32>, vector<8x8xf32>, vector<8x8xf32> -> vector<8x8xf32>
    %37 = vector.extract_strided_slice %8 {offsets = [16, 0], sizes = [8, 8], strides = [1, 1]} : vector<96x8xf32> to vector<8x8xf32>
    %38 = vector.extract_strided_slice %8 {offsets = [48, 0], sizes = [8, 8], strides = [1, 1]} : vector<96x8xf32> to vector<8x8xf32>
    %39 = vector.extract_strided_slice %8 {offsets = [80, 0], sizes = [8, 8], strides = [1, 1]} : vector<96x8xf32> to vector<8x8xf32>
    %cst_18 = arith.constant dense<0.000000e+00> : vector<8x8xf32>
    %40 = tpu.matmul %37, %38, %cst_18 {dimension_numbers = #tpu.dot_dimension_numbers<[0], [0], [1], [1], [0, 1, 1, 1], [], []>} : vector<8x8xf32>, vector<8x8xf32>, vector<8x8xf32> -> vector<8x8xf32>
    %cst_19 = arith.constant dense<0xFF800000> : vector<8xf32>
    %41 = vector.multi_reduction <maximumf>, %40, %cst_19 [1] : vector<8x8xf32> to vector<8xf32>
    %42 = vector.shape_cast %41 : vector<8xf32> to vector<8x1xf32>
    %43 = vector.broadcast %42 : vector<8x1xf32> to vector<8x8xf32>
    %44 = arith.subf %40, %43 : vector<8x8xf32>
    %45 = math.exp %44 : vector<8x8xf32>
    %cst_20 = arith.constant dense<0.000000e+00> : vector<8xf32>
    %46 = vector.multi_reduction <add>, %45, %cst_20 [1] : vector<8x8xf32> to vector<8xf32>
    %47 = vector.shape_cast %46 : vector<8xf32> to vector<8x1xf32>
    %48 = vector.broadcast %47 : vector<8x1xf32> to vector<8x8xf32>
    %49 = arith.divf %45, %48 : vector<8x8xf32>
    %cst_21 = arith.constant dense<0.000000e+00> : vector<8x8xf32>
    %50 = tpu.matmul %39, %49, %cst_21 {dimension_numbers = #tpu.dot_dimension_numbers<[1], [1], [0], [0], [0, 0, 1, 0], [], []>} : vector<8x8xf32>, vector<8x8xf32>, vector<8x8xf32> -> vector<8x8xf32>
    %51 = vector.extract_strided_slice %8 {offsets = [24, 0], sizes = [8, 8], strides = [1, 1]} : vector<96x8xf32> to vector<8x8xf32>
    %52 = vector.extract_strided_slice %8 {offsets = [56, 0], sizes = [8, 8], strides = [1, 1]} : vector<96x8xf32> to vector<8x8xf32>
    %53 = vector.extract_strided_slice %8 {offsets = [88, 0], sizes = [8, 8], strides = [1, 1]} : vector<96x8xf32> to vector<8x8xf32>
    %cst_22 = arith.constant dense<0.000000e+00> : vector<8x8xf32>
    %54 = tpu.matmul %51, %52, %cst_22 {dimension_numbers = #tpu.dot_dimension_numbers<[0], [0], [1], [1], [0, 1, 1, 1], [], []>} : vector<8x8xf32>, vector<8x8xf32>, vector<8x8xf32> -> vector<8x8xf32>
    %cst_23 = arith.constant dense<0xFF800000> : vector<8xf32>
    %55 = vector.multi_reduction <maximumf>, %54, %cst_23 [1] : vector<8x8xf32> to vector<8xf32>
    %56 = vector.shape_cast %55 : vector<8xf32> to vector<8x1xf32>
    %57 = vector.broadcast %56 : vector<8x1xf32> to vector<8x8xf32>
    %58 = arith.subf %54, %57 : vector<8x8xf32>
    %59 = math.exp %58 : vector<8x8xf32>
    %cst_24 = arith.constant dense<0.000000e+00> : vector<8xf32>
    %60 = vector.multi_reduction <add>, %59, %cst_24 [1] : vector<8x8xf32> to vector<8xf32>
    %61 = vector.shape_cast %60 : vector<8xf32> to vector<8x1xf32>
    %62 = vector.broadcast %61 : vector<8x1xf32> to vector<8x8xf32>
    %63 = arith.divf %59, %62 : vector<8x8xf32>
    %cst_25 = arith.constant dense<0.000000e+00> : vector<8x8xf32>
    %64 = tpu.matmul %53, %63, %cst_25 {dimension_numbers = #tpu.dot_dimension_numbers<[1], [1], [0], [0], [0, 0, 1, 0], [], []>} : vector<8x8xf32>, vector<8x8xf32>, vector<8x8xf32> -> vector<8x8xf32>
    %65 = tpu.concatenate %22, %36, %50, %64 in 0 : vector<8x8xf32>, vector<8x8xf32>, vector<8x8xf32>, vector<8x8xf32> -> vector<32x8xf32>
    %cst_26 = arith.constant dense<0.000000e+00> : vector<32x8xf32>
    %66 = tpu.matmul %2, %65, %cst_26 {dimension_numbers = #tpu.dot_dimension_numbers<[1], [0], [0], [1], [0, 0, 1, 1], [], []>} : vector<32x32xf32>, vector<32x8xf32>, vector<32x8xf32> -> vector<32x8xf32>
    %67 = vector.broadcast %3 : vector<32x1xf32> to vector<32x8xf32>
    %68 = arith.addf %66, %67 : vector<32x8xf32>
    %c0_27 = arith.constant 0 : index
    %c0_28 = arith.constant 0 : index
    %c0_29 = arith.constant 0 : index
    %69 = vector.load %arg5[%c0_27, %c0_28, %c0_29] : memref<2x32x8xf32, #tpu.memory_space<vmem>>, vector<1x32x8xf32>
    %70 = vector.shape_cast %69 : vector<1x32x8xf32> to vector<32x8xf32>
    %71 = vector.shape_cast %68 : vector<32x8xf32> to vector<1x32x8xf32>
    tpu.vector_store %arg5[%c0_27, %c0_28, %c0_29], %71 {strides = array<i32>} : memref<2x32x8xf32, #tpu.memory_space<vmem>>, vector<1x32x8xf32>,
    %c1 = arith.constant 1 : index
    %c0_30 = arith.constant 0 : index
    %c0_31 = arith.constant 0 : index
    %72 = vector.load %arg0[%c1, %c0_30, %c0_31] : memref<2x32x8xf32, #tpu.memory_space<vmem>>, vector<1x32x8xf32>
    %73 = vector.shape_cast %72 : vector<1x32x8xf32> to vector<32x8xf32>
    %cst_32 = arith.constant dense<0.000000e+00> : vector<96x8xf32>
    %74 = tpu.matmul %0, %73, %cst_32 {dimension_numbers = #tpu.dot_dimension_numbers<[1], [0], [0], [1], [0, 0, 1, 1], [], []>} : vector<96x32xf32>, vector<32x8xf32>, vector<96x8xf32> -> vector<96x8xf32>
    %75 = vector.broadcast %1 : vector<96x1xf32> to vector<96x8xf32>
    %76 = arith.addf %74, %75 : vector<96x8xf32>
    %77 = vector.extract_strided_slice %76 {offsets = [0, 0], sizes = [8, 8], strides = [1, 1]} : vector<96x8xf32> to vector<8x8xf32>
    %78 = vector.extract_strided_slice %76 {offsets = [32, 0], sizes = [8, 8], strides = [1, 1]} : vector<96x8xf32> to vector<8x8xf32>
    %79 = vector.extract_strided_slice %76 {offsets = [64, 0], sizes = [8, 8], strides = [1, 1]} : vector<96x8xf32> to vector<8x8xf32>
    %cst_33 = arith.constant dense<0.000000e+00> : vector<8x8xf32>
    %80 = tpu.matmul %77, %78, %cst_33 {dimension_numbers = #tpu.dot_dimension_numbers<[0], [0], [1], [1], [0, 1, 1, 1], [], []>} : vector<8x8xf32>, vector<8x8xf32>, vector<8x8xf32> -> vector<8x8xf32>
    %cst_34 = arith.constant dense<0xFF800000> : vector<8xf32>
    %81 = vector.multi_reduction <maximumf>, %80, %cst_34 [1] : vector<8x8xf32> to vector<8xf32>
    %82 = vector.shape_cast %81 : vector<8xf32> to vector<8x1xf32>
    %83 = vector.broadcast %82 : vector<8x1xf32> to vector<8x8xf32>
    %84 = arith.subf %80, %83 : vector<8x8xf32>
    %85 = math.exp %84 : vector<8x8xf32>
    %cst_35 = arith.constant dense<0.000000e+00> : vector<8xf32>
    %86 = vector.multi_reduction <add>, %85, %cst_35 [1] : vector<8x8xf32> to vector<8xf32>
    %87 = vector.shape_cast %86 : vector<8xf32> to vector<8x1xf32>
    %88 = vector.broadcast %87 : vector<8x1xf32> to vector<8x8xf32>
    %89 = arith.divf %85, %88 : vector<8x8xf32>
    %cst_36 = arith.constant dense<0.000000e+00> : vector<8x8xf32>
    %90 = tpu.matmul %79, %89, %cst_36 {dimension_numbers = #tpu.dot_dimension_numbers<[1], [1], [0], [0], [0, 0, 1, 0], [], []>} : vector<8x8xf32>, vector<8x8xf32>, vector<8x8xf32> -> vector<8x8xf32>
    %91 = vector.extract_strided_slice %76 {offsets = [8, 0], sizes = [8, 8], strides = [1, 1]} : vector<96x8xf32> to vector<8x8xf32>
    %92 = vector.extract_strided_slice %76 {offsets = [40, 0], sizes = [8, 8], strides = [1, 1]} : vector<96x8xf32> to vector<8x8xf32>
    %93 = vector.extract_strided_slice %76 {offsets = [72, 0], sizes = [8, 8], strides = [1, 1]} : vector<96x8xf32> to vector<8x8xf32>
    %cst_37 = arith.constant dense<0.000000e+00> : vector<8x8xf32>
    %94 = tpu.matmul %91, %92, %cst_37 {dimension_numbers = #tpu.dot_dimension_numbers<[0], [0], [1], [1], [0, 1, 1, 1], [], []>} : vector<8x8xf32>, vector<8x8xf32>, vector<8x8xf32> -> vector<8x8xf32>
    %cst_38 = arith.constant dense<0xFF800000> : vector<8xf32>
    %95 = vector.multi_reduction <maximumf>, %94, %cst_38 [1] : vector<8x8xf32> to vector<8xf32>
    %96 = vector.shape_cast %95 : vector<8xf32> to vector<8x1xf32>
    %97 = vector.broadcast %96 : vector<8x1xf32> to vector<8x8xf32>
    %98 = arith.subf %94, %97 : vector<8x8xf32>
    %99 = math.exp %98 : vector<8x8xf32>
    %cst_39 = arith.constant dense<0.000000e+00> : vector<8xf32>
    %100 = vector.multi_reduction <add>, %99, %cst_39 [1] : vector<8x8xf32> to vector<8xf32>
    %101 = vector.shape_cast %100 : vector<8xf32> to vector<8x1xf32>
    %102 = vector.broadcast %101 : vector<8x1xf32> to vector<8x8xf32>
    %103 = arith.divf %99, %102 : vector<8x8xf32>
    %cst_40 = arith.constant dense<0.000000e+00> : vector<8x8xf32>
    %104 = tpu.matmul %93, %103, %cst_40 {dimension_numbers = #tpu.dot_dimension_numbers<[1], [1], [0], [0], [0, 0, 1, 0], [], []>} : vector<8x8xf32>, vector<8x8xf32>, vector<8x8xf32> -> vector<8x8xf32>
    %105 = vector.extract_strided_slice %76 {offsets = [16, 0], sizes = [8, 8], strides = [1, 1]} : vector<96x8xf32> to vector<8x8xf32>
    %106 = vector.extract_strided_slice %76 {offsets = [48, 0], sizes = [8, 8], strides = [1, 1]} : vector<96x8xf32> to vector<8x8xf32>
    %107 = vector.extract_strided_slice %76 {offsets = [80, 0], sizes = [8, 8], strides = [1, 1]} : vector<96x8xf32> to vector<8x8xf32>
    %cst_41 = arith.constant dense<0.000000e+00> : vector<8x8xf32>
    %108 = tpu.matmul %105, %106, %cst_41 {dimension_numbers = #tpu.dot_dimension_numbers<[0], [0], [1], [1], [0, 1, 1, 1], [], []>} : vector<8x8xf32>, vector<8x8xf32>, vector<8x8xf32> -> vector<8x8xf32>
    %cst_42 = arith.constant dense<0xFF800000> : vector<8xf32>
    %109 = vector.multi_reduction <maximumf>, %108, %cst_42 [1] : vector<8x8xf32> to vector<8xf32>
    %110 = vector.shape_cast %109 : vector<8xf32> to vector<8x1xf32>
    %111 = vector.broadcast %110 : vector<8x1xf32> to vector<8x8xf32>
    %112 = arith.subf %108, %111 : vector<8x8xf32>
    %113 = math.exp %112 : vector<8x8xf32>
    %cst_43 = arith.constant dense<0.000000e+00> : vector<8xf32>
    %114 = vector.multi_reduction <add>, %113, %cst_43 [1] : vector<8x8xf32> to vector<8xf32>
    %115 = vector.shape_cast %114 : vector<8xf32> to vector<8x1xf32>
    %116 = vector.broadcast %115 : vector<8x1xf32> to vector<8x8xf32>
    %117 = arith.divf %113, %116 : vector<8x8xf32>
    %cst_44 = arith.constant dense<0.000000e+00> : vector<8x8xf32>
    %118 = tpu.matmul %107, %117, %cst_44 {dimension_numbers = #tpu.dot_dimension_numbers<[1], [1], [0], [0], [0, 0, 1, 0], [], []>} : vector<8x8xf32>, vector<8x8xf32>, vector<8x8xf32> -> vector<8x8xf32>
    %119 = vector.extract_strided_slice %76 {offsets = [24, 0], sizes = [8, 8], strides = [1, 1]} : vector<96x8xf32> to vector<8x8xf32>
    %120 = vector.extract_strided_slice %76 {offsets = [56, 0], sizes = [8, 8], strides = [1, 1]} : vector<96x8xf32> to vector<8x8xf32>
    %121 = vector.extract_strided_slice %76 {offsets = [88, 0], sizes = [8, 8], strides = [1, 1]} : vector<96x8xf32> to vector<8x8xf32>
    %cst_45 = arith.constant dense<0.000000e+00> : vector<8x8xf32>
    %122 = tpu.matmul %119, %120, %cst_45 {dimension_numbers = #tpu.dot_dimension_numbers<[0], [0], [1], [1], [0, 1, 1, 1], [], []>} : vector<8x8xf32>, vector<8x8xf32>, vector<8x8xf32> -> vector<8x8xf32>
    %cst_46 = arith.constant dense<0xFF800000> : vector<8xf32>
    %123 = vector.multi_reduction <maximumf>, %122, %cst_46 [1] : vector<8x8xf32> to vector<8xf32>
    %124 = vector.shape_cast %123 : vector<8xf32> to vector<8x1xf32>
    %125 = vector.broadcast %124 : vector<8x1xf32> to vector<8x8xf32>
    %126 = arith.subf %122, %125 : vector<8x8xf32>
    %127 = math.exp %126 : vector<8x8xf32>
    %cst_47 = arith.constant dense<0.000000e+00> : vector<8xf32>
    %128 = vector.multi_reduction <add>, %127, %cst_47 [1] : vector<8x8xf32> to vector<8xf32>
    %129 = vector.shape_cast %128 : vector<8xf32> to vector<8x1xf32>
    %130 = vector.broadcast %129 : vector<8x1xf32> to vector<8x8xf32>
    %131 = arith.divf %127, %130 : vector<8x8xf32>
    %cst_48 = arith.constant dense<0.000000e+00> : vector<8x8xf32>
    %132 = tpu.matmul %121, %131, %cst_48 {dimension_numbers = #tpu.dot_dimension_numbers<[1], [1], [0], [0], [0, 0, 1, 0], [], []>} : vector<8x8xf32>, vector<8x8xf32>, vector<8x8xf32> -> vector<8x8xf32>
    %133 = tpu.concatenate %90, %104, %118, %132 in 0 : vector<8x8xf32>, vector<8x8xf32>, vector<8x8xf32>, vector<8x8xf32> -> vector<32x8xf32>
    %cst_49 = arith.constant dense<0.000000e+00> : vector<32x8xf32>
    %134 = tpu.matmul %2, %133, %cst_49 {dimension_numbers = #tpu.dot_dimension_numbers<[1], [0], [0], [1], [0, 0, 1, 1], [], []>} : vector<32x32xf32>, vector<32x8xf32>, vector<32x8xf32> -> vector<32x8xf32>
    %135 = vector.broadcast %3 : vector<32x1xf32> to vector<32x8xf32>
    %136 = arith.addf %134, %135 : vector<32x8xf32>
    %c1_50 = arith.constant 1 : index
    %c0_51 = arith.constant 0 : index
    %c0_52 = arith.constant 0 : index
    %137 = vector.load %arg5[%c1_50, %c0_51, %c0_52] : memref<2x32x8xf32, #tpu.memory_space<vmem>>, vector<1x32x8xf32>
    %138 = vector.shape_cast %137 : vector<1x32x8xf32> to vector<32x8xf32>
    %139 = vector.shape_cast %136 : vector<32x8xf32> to vector<1x32x8xf32>
    tpu.vector_store %arg5[%c1_50, %c0_51, %c0_52], %139 {strides = array<i32>} : memref<2x32x8xf32, #tpu.memory_space<vmem>>, vector<1x32x8xf32>,
    return
  }
}

</mosaic_0001>

<bundles_post_ra>
// kernel: tpu_custom_call.1
= control target key start
LH: loop header
LB: loop body
LE: loop exit
PB: predicated region body
PF: predicated region fallthrough
CT: control target
= control target key end

     0   :  { %vm116_vm0 = vcmask 261120   ;;  %v2501_v2 = vmov 0   ;;  %v2502_v14 = vmov 0.0   ;;  %vm2503_vm1 = vmmov 0   ;;  %s2961_s0 = inlined_call_operand.vmem [shape: f32[2,32,8], index: 0, kind: input, shape index: {}]   ;;  %s2962_s1 = inlined_call_operand.vmem [shape: f32[96,32], index: 1, kind: input, shape index: {}]   ;;  %s2963_s2 = inlined_call_operand.vmem [shape: f32[96,1], index: 2, kind: input, shape index: {}]   ;;  %s2964_s3 = inlined_call_operand.vmem [shape: f32[32,32], index: 3, kind: input, shape index: {}]   ;;  %s2965_s4 = inlined_call_operand.vmem [shape: f32[32,1], index: 4, kind: input, shape index: {}]   ;;  %s2966_s5 = inlined_call_operand.vmem [shape: f32[2,32,8], index: 5, kind: output, shape index: {}]  }
   0x1   :  { %v55_v0 = vld [vmem:[%s2961_s0 + $0x18] sm:$0xff]  ;;  %v54_v1 = vld [vmem:[%s2961_s0 + $0x10] sm:$0xff]  ;;  %2467 = vset.pattern.permute.xlu0 %v2501_v2  ;;  %v2543_v3 = vld [vmem:[%s2962_s1] sm:$0xff]  ;;  %2330 = vmatprep.subr.mxu1 %v2502_v14  ;;  %vm310_vm2 = vcmask 64512  }
   0x2   :  { %2304 = vmatprep.subr.mxu0 %v55_v0  ;;  %v53_v4 = vld [vmem:[%s2961_s0 + $0x8] sm:$0xff]  ;;  %2312 = vmatprep.mubr.msk.f32.mxu0 %vm116_vm0, %v2543_v3  ;;  %v32_v5 = vld [vmem:[%s2963_s2] sm:$0xff]  ;;  %v2567_v9 = vld [vmem:[%s2962_s1 + $0x10] sm:$0xff] }
   0x3   :  { %2305 = vmatpush3.msra.mxu0 %v55_v0  ;;  %v52_v6 = vld [vmem:[%s2961_s0] sm:$0xff]  ;;  %58 = vperm.xlu0 %2467, %v32_v5   ;;  %v2562_v8 = vld [vmem:[%s2962_s1 + $0x8] sm:$0xff]  ;;  %v2579_v11 = vld [vmem:[%s2962_s1 + $0x18] sm:$0xff] }
   0x4   :  { %2306 = vmatprep.subr.mxu0 %v54_v1  ;;  %v36_v7 = vld [vmem:[%s2963_s2 + $0x20] sm:$0xff]  ;;  %v33_v10 = vld [vmem:[%s2963_s2 + $0x8] sm:$0xff]  ;;  %2332 = vmatprep.mubr.msk.f32.mxu1 %vm2503_vm1, %v2502_v14  ;;  %v2617_v26 = vld [vmem:[%s2962_s1 + $0x30] sm:$0xff] }
   0x5   :  { %2307 = vmatpush3.msra.mxu0 %v54_v1  ;;  %v2584_v12 = vld [vmem:[%s2962_s1 + $0x20] sm:$0xff]  ;;  %v2593_v13 = vld [vmem:[%s2962_s1 + $0x28] sm:$0xff]  ;;  %v2622_v27 = vld [vmem:[%s2962_s1 + $0x38] sm:$0xff] }
   0x6   :  { %2308 = vmatprep.subr.mxu0 %v53_v4  ;;  %v2627_v28 = vld [vmem:[%s2962_s1 + $0x40] sm:$0xff]  ;;  %v2638_v29 = vld [vmem:[%s2962_s1 + $0x48] sm:$0xff]  ;;  %v34_v59 = vld [vmem:[%s2963_s2 + $0x10] sm:$0xff] }
   0x7   :  { %2309 = vmatpush3.msra.mxu0 %v53_v4  ;;  %78 = vperm.xlu0 %2467, %v36_v7   ;;  %v37_v33 = vld [vmem:[%s2963_s2 + $0x28] sm:$0xff]  ;;  %v40_v41 = vld [vmem:[%s2963_s2 + $0x40] sm:$0xff]  ;;  %v38_v61 = vld [vmem:[%s2963_s2 + $0x30] sm:$0xff] }
   0x8   :  { %2310 = vmatprep.subr.mxu0 %v52_v6  ;;  %v41_v60 = vld [vmem:[%s2963_s2 + $0x48] sm:$0xff]  ;;  %v2695_v7 = vld [vmem:[%s2962_s1 + $0x58] sm:$0xff] }
   0x9   :  { %2311 = vmatpush3.msra.mxu0 %v52_v6  ;;  %v2690_v6 = vld [vmem:[%s2962_s1 + $0x50] sm:$0xff] }
   0xa   :  { %2313 = vmatmul.mubr.msk.f32.vlgmr.msra.gmra.mxu0 %vm116_vm0, %v2562_v8 }
   0xb   :  { %2315 = vmatprep.mubr.msk.f32.mxu0 %vm116_vm0, %v2567_v9  ;;  %63 = vperm.xlu0 %2467, %v33_v10  }
   0xe   :  { %2316 = vmatmul.mubr.msk.f32.gmra.mxu0 %vm116_vm0, %v2579_v11 }
   0xf   :  { %2318 = vmatprep.mubr.msk.f32.mxu0 %vm116_vm0, %v2584_v12 }
  0x12   :  { %2319 = vmatmul.mubr.msk.f32.gmra.mxu0 %vm116_vm0, %v2593_v13 }
  0x13   :  { %2321 = vmatprep.mubr.msk.f32.mxu0 %vm116_vm0, %v2617_v26 }
  0x16   :  { %2322 = vmatmul.mubr.msk.f32.gmra.mxu0 %vm116_vm0, %v2622_v27 }
  0x17   :  { %2324 = vmatprep.mubr.msk.f32.mxu0 %vm116_vm0, %v2627_v28 }
  0x1a   :  { %2325 = vmatmul.mubr.msk.f32.gmra.mxu0 %vm116_vm0, %v2638_v29 }
  0x1b   :  { %2327 = vmatprep.mubr.msk.f32.mxu0 %vm116_vm0, %v2690_v6 }
  0x1e   :  { %2328 = vmatmul.mubr.msk.f32.gmra.mxu0 %vm116_vm0, %v2695_v7 }
  0x7e   :  { %v2600_v16 = vpop.permute.xlu0 %58 }
  0x82   :  { %v2607_v22 = vpop.permute.xlu0 %78 }
  0x86   :  { %v2646_v34 = vpop.permute.xlu0 %63 }
  0xca   :  { %v2314_v15 = vpop.f32.mrf.mxu0 }
  0xcb   :  { %v225_v35 = vadd.f32 %v2314_v15, %v2646_v34 }
  0xcc   :  { %v219_v17 = vpop.f32.mrf.mxu0 }
  0xcd   :  { %v220_v18 = vadd.f32 %v219_v17, %v2600_v16 }
  0xce   :  { %v2603_v19 = vpop.f32.mrf.mxu0 }
  0xcf   :  { %278 = vxpose.xlu1.b32.start.end [1/1] (short) (narrow) %v220_v18, 8 }
  0xd0   :  { %v2605_v20 = vpop.f32.mrf.mxu0 }
  0xd2   :  { %v2320_v21 = vpop.f32.mrf.mxu0 }
  0xd4   :  { %v239_v23 = vpop.f32.mrf.mxu0 }
  0xd5   :  { %v240_v24 = vadd.f32 %v239_v23, %v2607_v22 }
  0xd6   :  { %v2653_v43 = vpop.f32.mrf.mxu0 }
  0xd7   :  { %2331 = vmatpush3.msra.mxu1 %v240_v24 }
  0xd8   :  { %2335 = vmatprep.subr.mxu1 %v2502_v14  ;;  %v249_v44 = vpop.f32.mrf.mxu0 }
  0xda   :  { %v2326_v45 = vpop.f32.mrf.mxu0 }
  0xdc   :  { %v259_v47 = vpop.f32.mrf.mxu0 }
  0xed   :  { %2468 = vset.pattern.permute.xlu1 %v2501_v2 }
 0x14b   :  { %v294_v25 = vpop.trf.xlu1 }
 0x14c   :  { %2333 = vmatmul.mubr.msk.f32.vlgmr.msra.gmra.mxu1 %vm310_vm2, %v294_v25 }
 0x14d   :  { %2337 = vmatprep.mubr.msk.f32.mxu1 %vm2503_vm1, %v2502_v14 }
 0x20c   :  { %v380_v30 = vpop.f32.mrf.mxu1 }
 0x20d   :  { %v384_v31 = vsel %vm310_vm2, %v380_v30, -inf }
 0x20e   :  { %385 = vmax.xlane.f32.xlu1 %v384_v31  ;;  %v2334_v32 = vpop.f32.mrf.mxu1 }
 0x21f   :  { %83 = vperm.xlu1 %2468, %v37_v33  }
 0x248   :  { %471 = vxpose.xlu1.b32.start.end [1/1] (short) (narrow) %v225_v35, 8  ;;  %v35_v35 = vld [vmem:[%s2963_s2 + $0x18] sm:$0xff] }
 0x297   :  { %v386_v36 = vpop.xlane.xlu1 %385 }
 0x298   :  { %v387_v37 = vsub.f32 %v380_v30, %v386_v36  ;;  %v42_v36 = vld [vmem:[%s2963_s2 + $0x50] sm:$0xff] }
 0x29a   :  { %v388_v38 = vmul.f32 1.442695, %v387_v37  ;;  %v39_v37 = vld [vmem:[%s2963_s2 + $0x38] sm:$0xff] }
 0x29b   :  { %v2657_v50 = vpop.permute.xlu1 %83 }
 0x29c   :  { %2469 = vpow2.f32 %v388_v38  ;;  %v245_v52 = vadd.f32 %v2320_v21, %v2657_v50 }
 0x2a9   :  { %v2470_v39 = vpop.eup %2469 }
 0x2aa   :  { %v390_v40 = vsel %vm310_vm2, %v2470_v39, 0.0 }
 0x2ab   :  { %391 = vadd.xlane.f32.xlu0 %v390_v40 }
 0x2c1   :  { %98 = vperm.xlu0 %2467, %v40_v41  }
 0x2c4   :  { %v487_v53 = vpop.trf.xlu1 }
 0x334   :  { %v392_v42 = vpop.xlane.xlu0 %391 }
 0x335   :  { %2471 = vrcp.f32 %v392_v42 }
 0x33c   :  { %v2655_v48 = vpop.permute.xlu0 %98 }
 0x33d   :  { %v260_v51 = vadd.f32 %v259_v47, %v2655_v48 }
 0x342   :  { %v2472_v46 = vpop.eup %2471 }
 0x343   :  { %v394_v49 = vmul.f32 %v2472_v46, %v2470_v39 }
 0x345   :  { %2336 = vmatpush3.xpose.msk.msra.mxu1 %vm310_vm2, %v394_v49  ;;  %v2329_v49 = vpop.f32.mrf.mxu0 }
 0x346   :  { %2340 = vmatprep.subr.mxu1 %v2502_v14 }
 0x348   :  { %2338 = vmatmul.mubr.msk.f32.vlgmr.msra.gmra.mxu1 %vm310_vm2, %v260_v51 }
 0x349   :  { %2341 = vmatpush3.msra.mxu1 %v245_v52  ;;  %2342 = vmatprep.mubr.msk.f32.mxu1 %vm2503_vm1, %v2502_v14  ;;  %v269_v52 = vpop.f32.mrf.mxu0 }
 0x34a   :  { %2345 = vmatprep.subr.mxu1 %v2502_v14 }
 0x34c   :  { %2343 = vmatmul.mubr.msk.f32.vlgmr.msra.gmra.mxu1 %vm310_vm2, %v487_v53 }
 0x34d   :  { %2347 = vmatprep.mubr.msk.f32.mxu1 %vm2503_vm1, %v2502_v14 }
 0x408   :  { %v2670_v54 = vpop.f32.mrf.mxu1 }
 0x40a   :  { %v2339_v55 = vpop.f32.mrf.mxu1 }
 0x40c   :  { %v572_v56 = vpop.f32.mrf.mxu1 }
 0x40d   :  { %v576_v57 = vsel %vm310_vm2, %v572_v56, -inf }
 0x40e   :  { %577 = vmax.xlane.f32.xlu0 %v576_v57  ;;  %v2344_v58 = vpop.f32.mrf.mxu1 }
 0x424   :  { %68 = vperm.xlu0 %2467, %v34_v59  }
 0x428   :  { %103 = vperm.xlu0 %2467, %v41_v60  }
 0x42c   :  { %88 = vperm.xlu0 %2467, %v38_v61  }
 0x497   :  { %v578_v62 = vpop.xlane.xlu0 %577 }
 0x498   :  { %v579_v63 = vsub.f32 %v572_v56, %v578_v62 }
 0x49a   :  { %v580_v0 = vmul.f32 1.442695, %v579_v63 }
 0x49c   :  { %2473 = vpow2.f32 %v580_v0 }
 0x49f   :  { %v2682_v1 = vpop.permute.xlu0 %68 }
 0x4a0   :  { %v230_v2 = vadd.f32 %v2605_v20, %v2682_v1 }
 0x4a2   :  { %663 = vxpose.xlu0.b32.start.end [1/1] (short) (narrow) %v230_v2, 8 }
 0x4a3   :  { %v2701_v15 = vpop.permute.xlu0 %103 }
 0x4a4   :  { %v265_v21 = vadd.f32 %v2326_v45, %v2701_v15 }
 0x4a7   :  { %v2703_v20 = vpop.permute.xlu0 %88 }
 0x4a8   :  { %v250_v23 = vadd.f32 %v249_v44, %v2703_v20 }
 0x4a9   :  { %v2474_v4 = vpop.eup %2473 }
 0x4aa   :  { %v582_v5 = vsel %vm310_vm2, %v2474_v4, 0.0 }
 0x4ab   :  { %583 = vadd.xlane.f32.xlu1 %v582_v5  ;;  %v43_v5 = vld [vmem:[%s2963_s2 + $0x58] sm:$0xff] }
 0x51e   :  { %v679_v24 = vpop.trf.xlu0 }
 0x534   :  { %v584_v10 = vpop.xlane.xlu1 %583 }
 0x535   :  { %2475 = vrcp.f32 %v584_v10 }
 0x542   :  { %v2476_v17 = vpop.eup %2475 }
 0x543   :  { %v586_v18 = vmul.f32 %v2476_v17, %v2474_v4 }
 0x545   :  { %2346 = vmatpush3.xpose.msk.msra.mxu1 %vm310_vm2, %v586_v18 }
 0x546   :  { %2350 = vmatprep.subr.mxu1 %v2502_v14 }
 0x548   :  { %2348 = vmatmul.mubr.msk.f32.vlgmr.msra.gmra.mxu1 %vm310_vm2, %v265_v21 }
 0x549   :  { %2351 = vmatpush3.msra.mxu1 %v250_v23  ;;  %2352 = vmatprep.mubr.msk.f32.mxu1 %vm2503_vm1, %v2502_v14  ;;  %v2191_v23 = vld [vmem:[%s2961_s0 + $0x38] sm:$0xff] }
 0x54a   :  { %2355 = vmatprep.subr.mxu1 %v2502_v14 }
 0x54c   :  { %2353 = vmatmul.mubr.msk.f32.vlgmr.msra.gmra.mxu1 %vm310_vm2, %v679_v24 }
 0x54d   :  { %2357 = vmatprep.mubr.msk.f32.mxu1 %vm2503_vm1, %v2502_v14 }
 0x608   :  { %v2716_v25 = vpop.f32.mrf.mxu1 }
 0x60a   :  { %v2349_v30 = vpop.f32.mrf.mxu1 }
 0x60b   :  { %v2190_v30 = vld [vmem:[%s2961_s0 + $0x30] sm:$0xff] }
 0x60c   :  { %v764_v31 = vpop.f32.mrf.mxu1 }
 0x60d   :  { %v768_v32 = vsel %vm310_vm2, %v764_v31, -inf }
 0x60e   :  { %769 = vmax.xlane.f32.xlu1 %v768_v32  ;;  %v2354_v33 = vpop.f32.mrf.mxu1  ;;  %v2188_v32 = vld [vmem:[%s2961_s0 + $0x20] sm:$0xff] }
 0x61f   :  { %73 = vperm.xlu1 %2468, %v35_v35  }
 0x623   :  { %108 = vperm.xlu1 %2468, %v42_v36  }
 0x627   :  { %93 = vperm.xlu1 %2468, %v39_v37  }
 0x697   :  { %v770_v38 = vpop.xlane.xlu1 %769 }
 0x698   :  { %v771_v39 = vsub.f32 %v764_v31, %v770_v38  ;;  %v2189_v31 = vld [vmem:[%s2961_s0 + $0x28] sm:$0xff] }
 0x69a   :  { %v772_v40 = vmul.f32 1.442695, %v771_v39 }
 0x69b   :  { %v2728_v41 = vpop.permute.xlu1 %73 }
 0x69c   :  { %2477 = vpow2.f32 %v772_v40  ;;  %v235_v42 = vadd.f32 %v2603_v19, %v2728_v41 }
 0x69e   :  { %855 = vxpose.xlu1.b32.start.end [1/1] (short) (narrow) %v235_v42, 8 }
 0x69f   :  { %v2733_v47 = vpop.permute.xlu1 %108 }
 0x6a0   :  { %v270_v56 = vadd.f32 %v269_v52, %v2733_v47 }
 0x6a3   :  { %v2735_v55 = vpop.permute.xlu1 %93 }
 0x6a4   :  { %v255_v19 = vadd.f32 %v2653_v43, %v2735_v55 }
 0x6a9   :  { %v2478_v44 = vpop.eup %2477 }
 0x6aa   :  { %v774_v45 = vsel %vm310_vm2, %v2478_v44, 0.0 }
 0x6ab   :  { %775 = vadd.xlane.f32.xlu0 %v774_v45 }
 0x71a   :  { %v871_v57 = vpop.trf.xlu1 }
 0x734   :  { %v776_v46 = vpop.xlane.xlu0 %775 }
 0x735   :  { %2479 = vrcp.f32 %v776_v46 }
 0x742   :  { %v2480_v51 = vpop.eup %2479 }
 0x743   :  { %v778_v53 = vmul.f32 %v2480_v51, %v2478_v44 }
 0x745   :  { %2356 = vmatpush3.xpose.msk.msra.mxu1 %vm310_vm2, %v778_v53 }
 0x746   :  { %2360 = vmatprep.subr.mxu1 %v2502_v14 }
 0x748   :  { %2358 = vmatmul.mubr.msk.f32.vlgmr.msra.gmra.mxu1 %vm310_vm2, %v270_v56 }
 0x749   :  { %2361 = vmatpush3.msra.mxu1 %v255_v19  ;;  %2362 = vmatprep.mubr.msk.f32.mxu1 %vm2503_vm1, %v2502_v14 }
 0x74a   :  { %2365 = vmatprep.subr.mxu1 %v2502_v14 }
 0x74c   :  { %2363 = vmatmul.mubr.msk.f32.vlgmr.msra.gmra.mxu1 %vm310_vm2, %v871_v57 }
 0x74d   :  { %2367 = vmatprep.mubr.msk.f32.mxu1 %vm2503_vm1, %v2502_v14 }
 0x808   :  { %v851_v58 = vpop.f32.mrf.mxu1 }
 0x80a   :  { %v2359_v59 = vpop.f32.mrf.mxu1 }
 0x80c   :  { %v956_v60 = vpop.f32.mrf.mxu1 }
 0x80d   :  { %v960_v61 = vsel %vm310_vm2, %v956_v60, -inf }
 0x80e   :  { %961 = vmax.xlane.f32.xlu0 %v960_v61  ;;  %v2364_v43 = vpop.f32.mrf.mxu1 }
 0x897   :  { %v962_v62 = vpop.xlane.xlu0 %961 }
 0x898   :  { %v963_v63 = vsub.f32 %v956_v60, %v962_v62 }
 0x89a   :  { %v964_v0 = vmul.f32 1.442695, %v963_v63 }
 0x89c   :  { %2481 = vpow2.f32 %v964_v0 }
 0x8a9   :  { %v2482_v2 = vpop.eup %2481 }
 0x8aa   :  { %v966_v4 = vsel %vm310_vm2, %v2482_v2, 0.0 }
 0x8ab   :  { %967 = vadd.xlane.f32.xlu0 %v966_v4 }
 0x8c1   :  { %113 = vperm.xlu0 %2467, %v43_v5  }
 0x934   :  { %v968_v10 = vpop.xlane.xlu0 %967 }
 0x935   :  { %2483 = vrcp.f32 %v968_v10 }
 0x93c   :  { %v2754_v18 = vpop.permute.xlu0 %113 }
 0x93d   :  { %v275_v24 = vadd.f32 %v2329_v49, %v2754_v18 }
 0x942   :  { %v2484_v17 = vpop.eup %2483 }
 0x943   :  { %v970_v21 = vmul.f32 %v2484_v17, %v2482_v2 }
 0x945   :  { %2366 = vmatpush3.xpose.msk.msra.mxu1 %vm310_vm2, %v970_v21 }
 0x946   :  { %2384 = vmatprep.subr.mxu1 %v2191_v23 }
 0x948   :  { %2368 = vmatmul.mubr.msk.f32.vlgmr.msra.gmra.mxu1 %vm310_vm2, %v275_v24 }
 0x949   :  { %2385 = vmatpush3.msra.mxu1 %v2191_v23  ;;  %2392 = vmatprep.mubr.msk.f32.mxu1 %vm116_vm0, %v2543_v3  ;;  %v44_v3 = vld [vmem:[%s2964_s3] sm:$0xff] }
 0x94a   :  { %2386 = vmatprep.subr.mxu1 %v2190_v30  ;;  %2378 = vmatprep.mubr.msk.f32.mxu0 %vm116_vm0, %v44_v3 }
 0x94b   :  { %2387 = vmatpush3.msra.mxu1 %v2190_v30 }
 0x94c   :  { %2388 = vmatprep.subr.mxu1 %v2189_v31 }
 0x94d   :  { %2389 = vmatpush3.msra.mxu1 %v2189_v31 }
 0x94e   :  { %2390 = vmatprep.subr.mxu1 %v2188_v32 }
 0x94f   :  { %2391 = vmatpush3.msra.mxu1 %v2188_v32 }
 0x950   :  { %2393 = vmatmul.mubr.msk.f32.vlgmr.msra.gmra.mxu1 %vm116_vm0, %v2562_v8 }
 0x951   :  { %2395 = vmatprep.mubr.msk.f32.mxu1 %vm116_vm0, %v2567_v9 }
 0x954   :  { %2396 = vmatmul.mubr.msk.f32.gmra.mxu1 %vm116_vm0, %v2579_v11  ;;  %v2805_v11 = vld [vmem:[%s2964_s3 + $0x8] sm:$0xff] }
 0x955   :  { %2398 = vmatprep.mubr.msk.f32.mxu1 %vm116_vm0, %v2584_v12  ;;  %v2811_v12 = vld [vmem:[%s2964_s3 + $0x10] sm:$0xff] }
 0x958   :  { %2399 = vmatmul.mubr.msk.f32.gmra.mxu1 %vm116_vm0, %v2593_v13 }
 0x959   :  { %2401 = vmatprep.mubr.msk.f32.mxu1 %vm116_vm0, %v2617_v26 }
 0x95c   :  { %2402 = vmatmul.mubr.msk.f32.gmra.mxu1 %vm116_vm0, %v2622_v27  ;;  %v2822_v27 = vld [vmem:[%s2964_s3 + $0x18] sm:$0xff] }
 0x95d   :  { %2404 = vmatprep.mubr.msk.f32.mxu1 %vm116_vm0, %v2627_v28 }
 0x960   :  { %2405 = vmatmul.mubr.msk.f32.gmra.mxu1 %vm116_vm0, %v2638_v29 }
 0x961   :  { %2407 = vmatprep.mubr.msk.f32.mxu1 %vm116_vm0, %v2690_v6 }
 0x964   :  { %2408 = vmatmul.mubr.msk.f32.gmra.mxu1 %vm116_vm0, %v2695_v7 }
 0x965   :  { %2458 = vmatprep.mubr.msk.f32.mxu1 %vm116_vm0, %v44_v3 }
 0xa08   :  { %v1043_v8 = vpop.f32.mrf.mxu1 }
 0xa09   :  { %2370 = vmatprep.subr.mxu0 %v1043_v8 }
 0xa0a   :  { %v2369_v9 = vpop.f32.mrf.mxu1  ;;  %2371 = vmatpush3.msra.mxu0 %v1043_v8 }
 0xa0b   :  { %2372 = vmatprep.subr.mxu0 %v851_v58  ;;  %v51_v9 = vld [vmem:[%s2965_s4 + $0x18] sm:$0xff] }
 0xa0c   :  { %2373 = vmatpush3.msra.mxu0 %v851_v58 }
 0xa0d   :  { %2374 = vmatprep.subr.mxu0 %v2716_v25 }
 0xa0e   :  { %2375 = vmatpush3.msra.mxu0 %v2716_v25 }
 0xa0f   :  { %2376 = vmatprep.subr.mxu0 %v2670_v54 }
 0xa10   :  { %2377 = vmatpush3.msra.mxu0 %v2670_v54  ;;  %v2394_v13 = vpop.f32.mrf.mxu1 }
 0xa11   :  { %2410 = vmatprep.subr.mxu0 %v2502_v14  ;;  %2379 = vmatmul.mubr.msk.f32.vlgmr.msra.gmra.mxu0 %vm116_vm0, %v2805_v11  ;;  %v1245_v40 = vadd.f32 %v2394_v13, %v2646_v34 }
 0xa12   :  { %v1239_v26 = vpop.f32.mrf.mxu1  ;;  %2381 = vmatprep.mubr.msk.f32.mxu0 %vm116_vm0, %v2811_v12 }
 0xa13   :  { %v1240_v28 = vadd.f32 %v1239_v26, %v2600_v16 }
 0xa14   :  { %v2825_v29 = vpop.f32.mrf.mxu1 }
 0xa15   :  { %1298 = vxpose.xlu1.b32.start.end [1/1] (short) (narrow) %v1240_v28, 8  ;;  %2382 = vmatmul.mubr.msk.f32.gmra.mxu0 %vm116_vm0, %v2822_v27  ;;  %v1255_v8 = vadd.f32 %v2825_v29, %v2728_v41 }
 0xa16   :  { %v1249_v54 = vpop.f32.mrf.mxu1  ;;  %2412 = vmatprep.mubr.msk.f32.mxu0 %vm2503_vm1, %v2502_v14 }
 0xa17   :  { %v1250_v10 = vadd.f32 %v1249_v54, %v2682_v1 }
 0xa18   :  { %v2400_v6 = vpop.f32.mrf.mxu1 }
 0xa19   :  { %v1265_v59 = vadd.f32 %v2400_v6, %v2657_v50 }
 0xa1a   :  { %v1259_v7 = vpop.f32.mrf.mxu1 }
 0xa1b   :  { %v1260_v25 = vadd.f32 %v1259_v7, %v2607_v22 }
 0xa1c   :  { %v2847_v52 = vpop.f32.mrf.mxu1 }
 0xa1d   :  { %2411 = vmatpush3.msra.mxu0 %v1260_v25 }
 0xa1e   :  { %2415 = vmatprep.subr.mxu0 %v2502_v14  ;;  %v1269_v53 = vpop.f32.mrf.mxu1 }
 0xa1f   :  { %v1270_v30 = vadd.f32 %v1269_v53, %v2703_v20 }
 0xa20   :  { %v2406_v56 = vpop.f32.mrf.mxu1 }
 0xa21   :  { %v1285_v24 = vadd.f32 %v2406_v56, %v2701_v15  ;;  %v48_v56 = vld [vmem:[%s2965_s4] sm:$0xff] }
 0xa22   :  { %v1279_v57 = vpop.f32.mrf.mxu1 }
 0xa23   :  { %v1280_v34 = vadd.f32 %v1279_v57, %v2655_v48 }
 0xa91   :  { %v1314_v33 = vpop.trf.xlu1 }
 0xa92   :  { %2413 = vmatmul.mubr.msk.f32.vlgmr.msra.gmra.mxu0 %vm310_vm2, %v1314_v33  ;;  %v2409_v33 = vpop.f32.mrf.mxu1 }
 0xa93   :  { %2417 = vmatprep.mubr.msk.f32.mxu0 %vm2503_vm1, %v2502_v14 }
 0xad1   :  { %v2836_v16 = vpop.f32.mrf.mxu0 }
 0xad3   :  { %v2838_v35 = vpop.f32.mrf.mxu0 }
 0xad5   :  { %v2840_v36 = vpop.f32.mrf.mxu0 }
 0xad7   :  { %v2842_v37 = vpop.f32.mrf.mxu0 }
 0xb52   :  { %v1399_v38 = vpop.f32.mrf.mxu0 }
 0xb53   :  { %v1403_v22 = vsel %vm310_vm2, %v1399_v38, -inf }
 0xb54   :  { %1404 = vmax.xlane.f32.xlu1 %v1403_v22  ;;  %v2414_v39 = vpop.f32.mrf.mxu0  ;;  %v1289_v22 = vpop.f32.mrf.mxu1 }
 0xb87   :  { %1490 = vxpose.xlu1.b32.start.end [1/1] (short) (narrow) %v1245_v40, 8  ;;  %v1290_v40 = vadd.f32 %v1289_v22, %v2733_v47 }
 0xbdd   :  { %v1405_v42 = vpop.xlane.xlu1 %1404 }
 0xbde   :  { %v1406_v44 = vsub.f32 %v1399_v38, %v1405_v42 }
 0xbe0   :  { %v1407_v45 = vmul.f32 1.442695, %v1406_v44 }
 0xbe2   :  { %2485 = vpow2.f32 %v1407_v45 }
 0xbef   :  { %v2486_v46 = vpop.eup %2485 }
 0xbf0   :  { %v1409_v49 = vsel %vm310_vm2, %v2486_v46, 0.0 }
 0xbf1   :  { %1410 = vadd.xlane.f32.xlu0 %v1409_v49 }
 0xc03   :  { %v1506_v60 = vpop.trf.xlu1 }
 0xc7a   :  { %v1411_v51 = vpop.xlane.xlu0 %1410 }
 0xc7b   :  { %2487 = vrcp.f32 %v1411_v51 }
 0xc88   :  { %v2488_v19 = vpop.eup %2487 }
 0xc89   :  { %v1413_v58 = vmul.f32 %v2488_v19, %v2486_v46  ;;  %v50_v19 = vld [vmem:[%s2965_s4 + $0x10] sm:$0xff] }
 0xc8b   :  { %2416 = vmatpush3.xpose.msk.msra.mxu0 %vm310_vm2, %v1413_v58 }
 0xc8c   :  { %2420 = vmatprep.subr.mxu0 %v2502_v14 }
 0xc8e   :  { %2418 = vmatmul.mubr.msk.f32.vlgmr.msra.gmra.mxu0 %vm310_vm2, %v1280_v34 }
 0xc8f   :  { %2421 = vmatpush3.msra.mxu0 %v1265_v59  ;;  %2422 = vmatprep.mubr.msk.f32.mxu0 %vm2503_vm1, %v2502_v14 }
 0xc90   :  { %2425 = vmatprep.subr.mxu0 %v2502_v14 }
 0xc92   :  { %2423 = vmatmul.mubr.msk.f32.vlgmr.msra.gmra.mxu0 %vm310_vm2, %v1506_v60 }
 0xc93   :  { %2427 = vmatprep.mubr.msk.f32.mxu0 %vm2503_vm1, %v2502_v14 }
 0xd4e   :  { %v2860_v61 = vpop.f32.mrf.mxu0 }
 0xd50   :  { %v2419_v48 = vpop.f32.mrf.mxu0 }
 0xd52   :  { %v1591_v43 = vpop.f32.mrf.mxu0 }
 0xd53   :  { %v1595_v50 = vsel %vm310_vm2, %v1591_v43, -inf }
 0xd54   :  { %1596 = vmax.xlane.f32.xlu0 %v1595_v50  ;;  %v2424_v62 = vpop.f32.mrf.mxu0 }
 0xddd   :  { %v1597_v63 = vpop.xlane.xlu0 %1596 }
 0xdde   :  { %v1598_v0 = vsub.f32 %v1591_v43, %v1597_v63 }
 0xde0   :  { %v1599_v2 = vmul.f32 1.442695, %v1598_v0 }
 0xde2   :  { %2489 = vpow2.f32 %v1599_v2 }
 0xdef   :  { %v2490_v4 = vpop.eup %2489 }
 0xdf0   :  { %v1601_v5 = vsel %vm310_vm2, %v2490_v4, 0.0 }
 0xdf1   :  { %1602 = vadd.xlane.f32.xlu0 %v1601_v5 }
 0xe1e   :  { %1682 = vxpose.xlu0.b32.start.end [1/1] (short) (narrow) %v1250_v10, 8 }
 0xe7a   :  { %v1603_v17 = vpop.xlane.xlu0 %1602 }
 0xe7b   :  { %2491 = vrcp.f32 %v1603_v17 }
 0xe88   :  { %v2492_v21 = vpop.eup %2491 }
 0xe89   :  { %v1605_v23 = vmul.f32 %v2492_v21, %v2490_v4 }
 0xe8b   :  { %2426 = vmatpush3.xpose.msk.msra.mxu0 %vm310_vm2, %v1605_v23 }
 0xe8c   :  { %2430 = vmatprep.subr.mxu0 %v2502_v14 }
 0xe8e   :  { %2428 = vmatmul.mubr.msk.f32.vlgmr.msra.gmra.mxu0 %vm310_vm2, %v1285_v24 }
 0xe8f   :  { %2431 = vmatpush3.msra.mxu0 %v1270_v30  ;;  %2432 = vmatprep.mubr.msk.f32.mxu0 %vm2503_vm1, %v2502_v14 }
 0xe90   :  { %2435 = vmatprep.subr.mxu0 %v2502_v14 }
 0xe9a   :  { %v1698_v1 = vpop.trf.xlu0 }
 0xe9b   :  { %2433 = vmatmul.mubr.msk.f32.vlgmr.msra.gmra.mxu0 %vm310_vm2, %v1698_v1 }
 0xe9c   :  { %2437 = vmatprep.mubr.msk.f32.mxu0 %vm2503_vm1, %v2502_v14 }
 0xf4e   :  { %v2876_v31 = vpop.f32.mrf.mxu0 }
 0xf50   :  { %v2429_v15 = vpop.f32.mrf.mxu0 }
 0xf5b   :  { %v1783_v32 = vpop.f32.mrf.mxu0 }
 0xf5c   :  { %v1787_v20 = vsel %vm310_vm2, %v1783_v32, -inf }
 0xf5d   :  { %1788 = vmax.xlane.f32.xlu1 %v1787_v20  ;;  %v2434_v3 = vpop.f32.mrf.mxu0 }
 0xf90   :  { %1874 = vxpose.xlu1.b32.start.end [1/1] (short) (narrow) %v1255_v8, 8 }
 0xfae   :  { %1064 = vperm.xlu1 %2468, %v51_v9  }
 0xfe6   :  { %v1789_v13 = vpop.xlane.xlu1 %1788 }
 0xfe7   :  { %v1790_v26 = vsub.f32 %v1783_v32, %v1789_v13 }
 0xfe9   :  { %v1791_v28 = vmul.f32 1.442695, %v1790_v26 }
 0xfeb   :  { %2493 = vpow2.f32 %v1791_v28 }
 0xff8   :  { %v2494_v54 = vpop.eup %2493 }
 0xff9   :  { %v1793_v6 = vsel %vm310_vm2, %v2494_v54, 0.0 }
 0xffa   :  { %1794 = vadd.xlane.f32.xlu0 %v1793_v6 }
0x100c   :  { %v1890_v7 = vpop.trf.xlu1 }
0x1029   :  { %v2885_v25 = vpop.permute.xlu1 %1064 }
0x102a   :  { %v1161_v41 = vadd.f32 %v2840_v36, %v2885_v25  ;;  %v1275_v36 = vadd.f32 %v2847_v52, %v2735_v55 }
0x102c   :  { %1167 = vst.msk [vmem:[%s2966_s5 + $0x18] sm:$0xff] %vm310_vm2, %v1161_v41 }
0x1083   :  { %v1795_v29 = vpop.xlane.xlu0 %1794 }
0x1084   :  { %2495 = vrcp.f32 %v1795_v29 }
0x1091   :  { %v2496_v38 = vpop.eup %2495 }
0x1092   :  { %v1797_v39 = vmul.f32 %v2496_v38, %v2494_v54 }
0x1094   :  { %2436 = vmatpush3.xpose.msk.msra.mxu0 %vm310_vm2, %v1797_v39 }
0x1095   :  { %2440 = vmatprep.subr.mxu0 %v2502_v14 }
0x1097   :  { %2438 = vmatmul.mubr.msk.f32.vlgmr.msra.gmra.mxu0 %vm310_vm2, %v1290_v40 }
0x1098   :  { %2441 = vmatpush3.msra.mxu0 %v1275_v36  ;;  %2442 = vmatprep.mubr.msk.f32.mxu0 %vm2503_vm1, %v2502_v14 }
0x1099   :  { %2445 = vmatprep.subr.mxu0 %v2502_v14 }
0x109b   :  { %2443 = vmatmul.mubr.msk.f32.vlgmr.msra.gmra.mxu0 %vm310_vm2, %v1890_v7 }
0x109c   :  { %2447 = vmatprep.mubr.msk.f32.mxu0 %vm2503_vm1, %v2502_v14  ;;  %v49_v14 = vld [vmem:[%s2965_s4 + $0x8] sm:$0xff] }
0x1157   :  { %v1870_v42 = vpop.f32.mrf.mxu0 }
0x1159   :  { %v2439_v47 = vpop.f32.mrf.mxu0 }
0x115b   :  { %v1975_v44 = vpop.f32.mrf.mxu0 }
0x115c   :  { %v1979_v45 = vsel %vm310_vm2, %v1975_v44, -inf }
0x115d   :  { %1980 = vmax.xlane.f32.xlu0 %v1979_v45  ;;  %v2444_v55 = vpop.f32.mrf.mxu0 }
0x11e6   :  { %v1981_v46 = vpop.xlane.xlu0 %1980 }
0x11e7   :  { %v1982_v49 = vsub.f32 %v1975_v44, %v1981_v46 }
0x11e9   :  { %v1983_v51 = vmul.f32 1.442695, %v1982_v49 }
0x11eb   :  { %2497 = vpow2.f32 %v1983_v51 }
0x11f8   :  { %v2498_v52 = vpop.eup %2497 }
0x11f9   :  { %v1985_v53 = vsel %vm310_vm2, %v2498_v52, 0.0 }
0x11fa   :  { %1986 = vadd.xlane.f32.xlu0 %v1985_v53 }
0x1210   :  { %1049 = vperm.xlu0 %2467, %v48_v56  }
0x1214   :  { %1054 = vperm.xlu0 %2467, %v49_v14  }
0x1218   :  { %1059 = vperm.xlu0 %2467, %v50_v19  }
0x1283   :  { %v1987_v57 = vpop.xlane.xlu0 %1986 }
0x1284   :  { %2499 = vrcp.f32 %v1987_v57 }
0x128b   :  { %v1050_v58 = vpop.permute.xlu0 %1049 }
0x128c   :  { %v1146_v34 = vadd.f32 %v2838_v35, %v1050_v58  ;;  %v1295_v35 = vadd.f32 %v2409_v33, %v2754_v18 }
0x128e   :  { %1164 = vst.msk [vmem:[%s2966_s5] sm:$0xff] %vm310_vm2, %v1146_v34 }
0x128f   :  { %v1055_v59 = vpop.permute.xlu0 %1054 }
0x1290   :  { %v1151_v60 = vadd.f32 %v2836_v16, %v1055_v59 }
0x1291   :  { %v2500_v48 = vpop.eup %2499 }
0x1292   :  { %1165 = vst.msk [vmem:[%s2966_s5 + $0x8] sm:$0xff] %vm310_vm2, %v1151_v60  ;;  %v1989_v43 = vmul.f32 %v2500_v48, %v2498_v52 }
0x1293   :  { %v1060_v50 = vpop.permute.xlu0 %1059 }
0x1294   :  { %v1156_v62 = vadd.f32 %v2842_v37, %v1060_v50  ;;  %2446 = vmatpush3.xpose.msk.msra.mxu0 %vm310_vm2, %v1989_v43 }
0x1296   :  { %1166 = vst.msk [vmem:[%s2966_s5 + $0x10] sm:$0xff] %vm310_vm2, %v1156_v62 }
0x1297   :  { %2448 = vmatmul.mubr.msk.f32.vlgmr.msra.gmra.mxu0 %vm310_vm2, %v1295_v35 }
0x1357   :  { %v2062_v16 = vpop.f32.mrf.mxu0 }
0x1358   :  { %2450 = vmatprep.subr.mxu1 %v2062_v16 }
0x1359   :  { %v2449_v63 = vpop.f32.mrf.mxu0  ;;  %2451 = vmatpush3.msra.mxu1 %v2062_v16 }
0x135a   :  { %2452 = vmatprep.subr.mxu1 %v1870_v42 }
0x135b   :  { %2453 = vmatpush3.msra.mxu1 %v1870_v42 }
0x135c   :  { %2454 = vmatprep.subr.mxu1 %v2876_v31 }
0x135d   :  { %2455 = vmatpush3.msra.mxu1 %v2876_v31 }
0x135e   :  { %2456 = vmatprep.subr.mxu1 %v2860_v61 }
0x135f   :  { %2457 = vmatpush3.msra.mxu1 %v2860_v61 }
0x1360   :  { %2459 = vmatmul.mubr.msk.f32.vlgmr.msra.gmra.mxu1 %vm116_vm0, %v2805_v11 }
0x1361   :  { %2461 = vmatprep.mubr.msk.f32.mxu1 %vm116_vm0, %v2811_v12 }
0x1364   :  { %2462 = vmatmul.mubr.msk.f32.gmra.mxu1 %vm116_vm0, %v2822_v27 }
0x1420   :  { %v2460_v18 = vpop.f32.mrf.mxu1 }
0x1421   :  { %v2138_v37 = vadd.f32 %v2460_v18, %v1055_v59 }
0x1422   :  { %v2132_v0 = vpop.f32.mrf.mxu1 }
0x1423   :  { %2221 = vst.msk [vmem:[%s2966_s5 + $0x28] sm:$0xff] %vm310_vm2, %v2138_v37  ;;  %v2133_v2 = vadd.f32 %v2132_v0, %v1050_v58 }
0x1424   :  { %v2463_v4 = vpop.f32.mrf.mxu1 }
0x1425   :  { %2220 = vst.msk [vmem:[%s2966_s5 + $0x20] sm:$0xff] %vm310_vm2, %v2133_v2  ;;  %v2148_v11 = vadd.f32 %v2463_v4, %v2885_v25 }
0x1426   :  { %v2142_v12 = vpop.f32.mrf.mxu1 }
0x1427   :  { %2223 = vst.msk [vmem:[%s2966_s5 + $0x38] sm:$0xff] %vm310_vm2, %v2148_v11  ;;  %v2143_v27 = vadd.f32 %v2142_v12, %v1060_v50 }
0x1429   :  { %2222 = vst.msk [vmem:[%s2966_s5 + $0x30] sm:$0xff] %vm310_vm2, %v2143_v27 }

</bundles_post_ra>
